<compile_context>
chip_gen: v5e
topology: v5e:2x2
jax: 0.10.0
libtpu: 0.0.40
codegen_flags: <defaults>
</compile_context>

<pallas_src>
import jax
import jax.numpy as jnp
from jax.experimental import pallas as pl
from jax.experimental.pallas import tpu as pltpu


def _round_up(x, m):
    return ((x + m - 1) // m) * m


def _vmem_budget_bytes():
    """~85% of this chip's physical VMEM (128 MiB v5e/v6e, 64 MiB v7x)."""
    cap = None
    try:
        cap = getattr(pltpu.get_tpu_info(), "vmem_capacity_bytes", None)
    except Exception:
        cap = None
    if not cap:
        cap = 64 * 1024 * 1024          # conservative fallback (v7x-sized)
    return int(0.85 * cap)


def _pick_tm(N, row_bytes, resident_bytes, budget, target):
    """Largest sublane-aligned row tile that fits the VMEM budget."""
    headroom = 4 * 1024 * 1024          # compiler internal scratch
    avail = budget - resident_bytes - headroom
    tm_cap = (avail // max(row_bytes, 1)) // 8 * 8 if avail > 0 else 8
    tm = max(8, min(target, tm_cap, _round_up(N, 8)))
    # Keep >= 2 row tiles when N allows so both v7x TensorCores get work
    # (row axis is marked "parallel"); also amortizes per-step overhead.
    if N >= 16:
        tm = min(tm, _round_up((N + 1) // 2, 8))
    return max(8, tm)


def _split_kernel(x0_ref, x1_ref, w0_ref, w1_ref, b0_ref, b1_ref, out_ref):
    """out[:, :C] = x0@W0 + b0 ; out[:, C:] = x1@W1 + (b1 + layer_emb).

    Used only when 2C is a multiple of 128, so both half-stores are
    lane-aligned unmasked stores.
    """
    C = b0_ref.shape[-1]
    y0 = jnp.dot(x0_ref[...], w0_ref[...],
                 preferred_element_type=jnp.float32) + b0_ref[...]
    y1 = jnp.dot(x1_ref[...], w1_ref[...],
                 preferred_element_type=jnp.float32) + b1_ref[...]
    out_ref[:, :C] = y0.astype(out_ref.dtype)
    out_ref[:, C:] = y1.astype(out_ref.dtype)


def _fused_kernel(x_ref, w_ref, b_ref, out_ref):
    """Tiny-C path: one block-diagonal matmul + one full-block store."""
    y = jnp.dot(x_ref[...], w_ref[...],
                preferred_element_type=jnp.float32) + b_ref[...]
    out_ref[...] = y.astype(out_ref.dtype)


def multi_connector_forward(feat0, feat1, w0, b0, w1, b1, layer_embedding,
                            *, target_tm=1024, compute_dtype=None):
    """feat0: [B,P,D0], feat1: [B,P,D1] -> interleaved [B, 2P, C]."""
    B, P, D0 = feat0.shape
    B1, P1, D1 = feat1.shape
    assert (B, P) == (B1, P1)
    C = w0.shape[1]
    assert w1.shape[1] == C
    N = B * P
    out_dtype = feat0.dtype

    # Optional reduced-precision streaming (halves HBM/DMA bytes; MXU-native
    # bf16 on v6e/v7x).  Off by default to preserve module semantics.
    if compute_dtype is not None:
        feat0, feat1 = feat0.astype(compute_dtype), feat1.astype(compute_dtype)
        w0, w1 = w0.astype(compute_dtype), w1.astype(compute_dtype)
        b0, b1 = b0.astype(compute_dtype), b1.astype(compute_dtype)
        layer_embedding = layer_embedding.astype(compute_dtype)

    x0 = feat0.reshape(N, D0)
    x1 = feat1.reshape(N, D1)
    b0r = b0.reshape(1, C)
    # Fold layer_embedding[0] into connector-1's bias: a one-time (1, C) add
    # in the wrapper instead of an extra DMA + broadcast add every grid step.
    b1r = (b1 + layer_embedding[0]).reshape(1, C)

    itemsize = jnp.dtype(x0.dtype).itemsize
    budget = _vmem_budget_bytes()
    fused = (2 * C) % 128 != 0          # sub-128-lane halves -> fuse the store

    if fused:
        # x_cat @ block_diag(W0, W1) + [b0 | b1+emb]: one dot, one full store.
        x_in = jnp.concatenate([x0, x1], axis=1)                  # [N, D0+D1]
        w_cat = jnp.zeros((D0 + D1, 2 * C), dtype=w0.dtype)
        w_cat = w_cat.at[:D0, :C].set(w0).at[D0:, C:].set(w1)
        b_cat = jnp.concatenate([b0r, b1r], axis=1)               # [1, 2C]
        resident = ((D0 + D1) * 2 * C + 2 * C) * itemsize
    else:
        resident = ((D0 + D1) * C + 2 * C) * itemsize

    # Double-buffered x row tile(s) + double-buffered output tile, per row.
    row_bytes = 2 * (D0 + D1 + 2 * C) * itemsize
    tm = _pick_tm(N, row_bytes, resident, budget, target_tm)
    grid_m = pl.cdiv(N, tm)
    # NOTE: when N % tm != 0 the last grid step computes on Pallas-padded
    # garbage rows; out-of-range output rows are masked/dropped by Pallas.
    # Keep this in mind if this is ever refactored to manual DMA.

    def const_spec(shape, single_buffered):
        idx = lambda i: (0,) * len(shape)
        if single_buffered:
            # Block index never changes -> no need for double buffering.
            return pl.BlockSpec(shape, idx, pipeline_mode=pl.Buffered(1))
        return pl.BlockSpec(shape, idx)

    def run(single_buffered):
        if fused:
            in_specs = [
                pl.BlockSpec((tm, D0 + D1), lambda i: (i, 0)),     # x_cat tile
                const_spec((D0 + D1, 2 * C), single_buffered),     # block-diag W
                const_spec((1, 2 * C), single_buffered),           # fused bias
            ]
            args = (x_in, w_cat, b_cat)
            kernel = _fused_kernel
        else:
            in_specs = [
                pl.BlockSpec((tm, D0), lambda i: (i, 0)),          # x0 row tile
                pl.BlockSpec((tm, D1), lambda i: (i, 0)),          # x1 row tile
                const_spec((D0, C), single_buffered),              # W0 resident
                const_spec((D1, C), single_buffered),              # W1 resident
                const_spec((1, C), single_buffered),               # b0
                const_spec((1, C), single_buffered),               # b1 + emb
            ]
            args = (x0, x1, w0, w1, b0r, b1r)
            kernel = _split_kernel
        return pl.pallas_call(
            kernel,
            out_shape=jax.ShapeDtypeStruct((N, 2 * C), out_dtype),
            grid_spec=pltpu.PrefetchScalarGridSpec(
                num_scalar_prefetch=0,
                grid=(grid_m,),
                in_specs=in_specs,
                out_specs=pl.BlockSpec((tm, 2 * C), lambda i: (i, 0)),
            ),
            compiler_params=pltpu.CompilerParams(
                dimension_semantics=("parallel",),
                vmem_limit_bytes=budget),
        )(*args)

    try:
        out = run(single_buffered=True)
    except Exception:
        # Fallback if this JAX build rejects pl.Buffered on top-level specs.
        out = run(single_buffered=False)

    # [N, 2C] row-major bytes == [B, P, 2, C] == interleaved [B, 2P, C].
    return out.reshape(B, 2 * P, C)


if __name__ == "__main__":
    key = jax.random.PRNGKey(0)

    def make_case(case_key, B, P, D0, D1, C):
        k = jax.random.split(case_key, 7)
        feat0 = jax.random.normal(k[0], (B, P, D0), dtype=jnp.float32)
        feat1 = jax.random.normal(k[1], (B, P, D1), dtype=jnp.float32)
        w0 = jax.random.normal(k[2], (D0, C), dtype=jnp.float32) * 0.02
        b0 = jax.random.normal(k[3], (C,), dtype=jnp.float32) * 0.02
        w1 = jax.random.normal(k[4], (D1, C), dtype=jnp.float32) * 0.02
        b1 = jax.random.normal(k[5], (C,), dtype=jnp.float32) * 0.02
        # nn.Parameter(torch.zeros(num_connector-1, hidden_size_projector)) —
        # use non-zero values so the embedding-add path is exercised.
        emb = jax.random.normal(k[6], (1, C), dtype=jnp.float32) * 0.02
        return feat0, feat1, w0, b0, w1, b1, emb

    def reference(feat0, feat1, w0, b0, w1, b1, emb):
        y0 = feat0 @ w0 + b0
        y1 = feat1 @ w1 + b1 + emb[0][None, None, :]
        B, P, C = y0.shape
        ref = jnp.zeros((B, 2 * P, C), dtype=feat0.dtype)
        ref = ref.at[:, 0::2, :].set(y0)
        ref = ref.at[:, 1::2, :].set(y1)
        return ref

    k1, k2 = jax.random.split(key)

    # Case 1: module-implied small shapes (C=32 -> tiny-C fused path).
    args1 = make_case(k1, B=2, P=8, D0=48, D1=64, C=32)
    out1 = jax.block_until_ready(multi_connector_forward(*args1))
    ref1 = reference(*args1)
    assert out1.shape == ref1.shape
    assert jnp.allclose(out1, ref1, atol=1e-5, rtol=1e-5)

    # Case 2: 2C is a multiple of 128 -> split (two-matmul) path.
    args2 = make_case(k2, B=2, P=8, D0=48, D1=64, C=64)
    out2 = jax.block_until_ready(multi_connector_forward(*args2))
    ref2 = reference(*args2)
    assert out2.shape == ref2.shape
    assert jnp.allclose(out2, ref2, atol=1e-5, rtol=1e-5)

    print("KERNEL_OK")
</pallas_src>

<mosaic_0001>
module attributes {stable_mosaic.version = 11 : i64} {
  func.func @_fused_kernel(%arg0: i32, %arg1: memref<8x112xf32, #tpu.memory_space<vmem>>, %arg2: memref<112x64xf32, #tpu.memory_space<vmem>>, %arg3: memref<1x64xf32, #tpu.memory_space<vmem>>, %arg4: memref<8x64xf32, #tpu.memory_space<vmem>>) attributes {dimension_semantics = [#tpu.dimension_semantics<parallel>], iteration_bounds = array<i64: 2>, scalar_prefetch = 0 : i64, scratch_operands = 0 : i64, tpu.core_type = #tpu.core_type<tc>, window_params = [{transform_indices = @transform_0, window_bounds = array<i64: 8, 112>}, {pipeline_mode = #tpu.pipeline_mode<synchronous>, transform_indices = @transform_1, window_bounds = array<i64: 112, 64>}, {pipeline_mode = #tpu.pipeline_mode<synchronous>, transform_indices = @transform_2, window_bounds = array<i64: 1, 64>}, {transform_indices = @transform_3, window_bounds = array<i64: 8, 64>}]} {
    %c0 = arith.constant 0 : index
    %c0_0 = arith.constant 0 : index
    %0 = vector.load %arg1[%c0, %c0_0] : memref<8x112xf32, #tpu.memory_space<vmem>>, vector<8x112xf32>
    %c0_1 = arith.constant 0 : index
    %c0_2 = arith.constant 0 : index
    %1 = vector.load %arg2[%c0_1, %c0_2] : memref<112x64xf32, #tpu.memory_space<vmem>>, vector<112x64xf32>
    %cst = arith.constant dense<0.000000e+00> : vector<8x64xf32>
    %2 = tpu.matmul %0, %1, %cst {dimension_numbers = #tpu.dot_dimension_numbers<[1], [0], [0], [1], [0, 0, 1, 1], [], []>} : vector<8x112xf32>, vector<112x64xf32>, vector<8x64xf32> -> vector<8x64xf32>
    %c0_3 = arith.constant 0 : index
    %c0_4 = arith.constant 0 : index
    %3 = vector.load %arg3[%c0_3, %c0_4] : memref<1x64xf32, #tpu.memory_space<vmem>>, vector<1x64xf32>
    %4 = vector.broadcast %3 : vector<1x64xf32> to vector<8x64xf32>
    %5 = arith.addf %2, %4 : vector<8x64xf32>
    %c0_5 = arith.constant 0 : index
    %c0_6 = arith.constant 0 : index
    %6 = vector.load %arg4[%c0_5, %c0_6] : memref<8x64xf32, #tpu.memory_space<vmem>>, vector<8x64xf32>
    tpu.vector_store %arg4[%c0_5, %c0_6], %5 {strides = array<i32>} : memref<8x64xf32, #tpu.memory_space<vmem>>, vector<8x64xf32>,
    return
  }
  func.func @transform_0(%arg0: i32) -> (i32, i32) {
    %c0_i32 = arith.constant 0 : i32
    %c0_i32_0 = arith.constant 0 : i32
    return %arg0, %c0_i32 : i32, i32
  }
  func.func @transform_1(%arg0: i32) -> (i32, i32) {
    %c0_i32 = arith.constant 0 : i32
    %c0_i32_0 = arith.constant 0 : i32
    %c0_i32_1 = arith.constant 0 : i32
    return %c0_i32, %c0_i32_0 : i32, i32
  }
  func.func @transform_2(%arg0: i32) -> (i32, i32) {
    %c0_i32 = arith.constant 0 : i32
    %c0_i32_0 = arith.constant 0 : i32
    %c0_i32_1 = arith.constant 0 : i32
    return %c0_i32, %c0_i32_0 : i32, i32
  }
  func.func @transform_3(%arg0: i32) -> (i32, i32) {
    %c0_i32 = arith.constant 0 : i32
    %c0_i32_0 = arith.constant 0 : i32
    return %arg0, %c0_i32 : i32, i32
  }
}

module attributes {stable_mosaic.version = 11 : i64} {
  func.func @_fused_kernel(%arg0: i32, %arg1: memref<8x112xf32, #tpu.memory_space<vmem>>, %arg2: memref<112x64xf32, #tpu.memory_space<vmem>>, %arg3: memref<1x64xf32, #tpu.memory_space<vmem>>, %arg4: memref<8x64xf32, #tpu.memory_space<vmem>>) attributes {dimension_semantics = [#tpu.dimension_semantics<parallel>], iteration_bounds = array<i64: 2>, scalar_prefetch = 0 : i64, scratch_operands = 0 : i64, tpu.core_type = #tpu.core_type<tc>, window_params = [{transform_indices = @transform_0, window_bounds = array<i64: 8, 112>}, {pipeline_mode = #tpu.pipeline_mode<synchronous>, transform_indices = @transform_1, window_bounds = array<i64: 112, 64>}, {pipeline_mode = #tpu.pipeline_mode<synchronous>, transform_indices = @transform_2, window_bounds = array<i64: 1, 64>}, {transform_indices = @transform_3, window_bounds = array<i64: 8, 64>}]} {
    %c0 = arith.constant 0 : index
    %c0_0 = arith.constant 0 : index
    %0 = vector.load %arg1[%c0, %c0_0] : memref<8x112xf32, #tpu.memory_space<vmem>>, vector<8x112xf32>
    %c0_1 = arith.constant 0 : index
    %c0_2 = arith.constant 0 : index
    %1 = vector.load %arg2[%c0_1, %c0_2] : memref<112x64xf32, #tpu.memory_space<vmem>>, vector<112x64xf32>
    %cst = arith.constant dense<0.000000e+00> : vector<8x64xf32>
    %2 = tpu.matmul %0, %1, %cst {dimension_numbers = #tpu.dot_dimension_numbers<[1], [0], [0], [1], [0, 0, 1, 1], [], []>} : vector<8x112xf32>, vector<112x64xf32>, vector<8x64xf32> -> vector<8x64xf32>
    %c0_3 = arith.constant 0 : index
    %c0_4 = arith.constant 0 : index
    %3 = vector.load %arg3[%c0_3, %c0_4] : memref<1x64xf32, #tpu.memory_space<vmem>>, vector<1x64xf32>
    %4 = vector.broadcast %3 : vector<1x64xf32> to vector<8x64xf32>
    %5 = arith.addf %2, %4 : vector<8x64xf32>
    %c0_5 = arith.constant 0 : index
    %c0_6 = arith.constant 0 : index
    %6 = vector.load %arg4[%c0_5, %c0_6] : memref<8x64xf32, #tpu.memory_space<vmem>>, vector<8x64xf32>
    tpu.vector_store %arg4[%c0_5, %c0_6], %5 {strides = array<i32>} : memref<8x64xf32, #tpu.memory_space<vmem>>, vector<8x64xf32>,
    return
  }
  func.func @transform_0(%arg0: i32) -> (i32, i32) {
    %c0_i32 = arith.constant 0 : i32
    %c0_i32_0 = arith.constant 0 : i32
    return %arg0, %c0_i32 : i32, i32
  }
  func.func @transform_1(%arg0: i32) -> (i32, i32) {
    %c0_i32 = arith.constant 0 : i32
    %c0_i32_0 = arith.constant 0 : i32
    %c0_i32_1 = arith.constant 0 : i32
    return %c0_i32, %c0_i32_0 : i32, i32
  }
  func.func @transform_2(%arg0: i32) -> (i32, i32) {
    %c0_i32 = arith.constant 0 : i32
    %c0_i32_0 = arith.constant 0 : i32
    %c0_i32_1 = arith.constant 0 : i32
    return %c0_i32, %c0_i32_0 : i32, i32
  }
  func.func @transform_3(%arg0: i32) -> (i32, i32) {
    %c0_i32 = arith.constant 0 : i32
    %c0_i32_0 = arith.constant 0 : i32
    return %arg0, %c0_i32 : i32, i32
  }
}

</mosaic_0001>

<bundles_post_ra>
// kernel: tpu_custom_call.1
= control target key start
LH: loop header
LB: loop body
LE: loop exit
PB: predicated region body
PF: predicated region fallthrough
CT: control target
= control target key end

     0   :  { %8 = vsyncpa [#allocation3], 0  ;;  %s551_s0 = inlined_call_operand.vmem [shape: f32[16,112], index: 0, kind: input, shape index: {}]   ;;  %s552_s1 = inlined_call_operand.vmem [shape: f32[112,64], index: 1, kind: input, shape index: {}]   ;;  %s553_s2 = inlined_call_operand.vmem [shape: f32[1,64], index: 2, kind: input, shape index: {}]   ;;  %s554_s3 = inlined_call_operand.hbm [shape: f32[16,64], index: 3, kind: output, shape index: {}]  }
   0x1   :  { %10 = vsyncpa [#allocation3 + $0x1], 0  ;;  %s421_s12 = smov 0   ;;  %s423_s13 = smov 0  }
   0x2   :  { %s425_s14 = smov 0   ;;  %s427_s15 = smov 0  }
   0x3 LB: > { %s442_s16 = sadd.s32 4294967295, %s399_s15   ;;  %s286_s17 = sadd.s32 4294967294, %s399_s15   ;;  %s399_s15 = sphi %s427_s15, %s560_s15   ;;  %s395_s14 = sphi %s425_s14, %s559_s14   ;;  %s391_s13 = sphi %s423_s13, %s558_s13   ;;  %s387_s12 = sphi %s421_s12, %s557_s12  }
   0x4   : > { %s446_s18 = sadd.s32 1, %s399_s15   ;;  %s91_s19 = sadd.s32 1, %s395_s14 }
   0x5   : > { %s88_s20 = ssub.s32 %s399_s15, %s446_s18  ;;  %p101_p0 = scmp.ne.s32.totalorder %s395_s14, %s391_s13 }
   0x6   : > { %p89_p1 = scmp.eq.s32.totalorder %s88_s20, 0  ;;  %p102_p2 = scmp.eq.s32.totalorder %s442_s16, 1 }
   0x7   : > { %p107_p3 = scmp.ne.s32.totalorder %s391_s13, %s387_s12  ;;  %p108_p4 = scmp.eq.s32.totalorder %s286_s17, 1 }
   0x8   : > { %s457_s21 = scalar_select %p89_p1, %s395_s14, %s91_s19  }
   0x9   : > { %p459_p5 = por %p102_p2, %p101_p0  ;;  %p463_p6 = por %p108_p4, %p107_p3 }
   0xa   : > { %p289_p7 = scmp.ge.s32.totalorder %s399_s15, 1  ;;  %p139_p8 = scmp.lt.s32.totalorder %s399_s15, 3 }
   0xc   : > { %p140_p9 = pnand %p289_p7, %p139_p8 }
   0xd   : > { %p162_p10 = scmp.lt.s32.totalorder (!%p140_p9), %s442_s16, 1  ;;  %s159_s17 = sand.u32 (!%p140_p9), 1, %s391_s13  }
   0xe   : > { %143 = sbr.rel (%p140_p9) target bundleno = 178 (0xb2), region = 32  ;;  %s290_s19 = sshll.u32 (!%p140_p9), %s159_s17, 3 }
   0xf   : > { %s294_s20 = sshll.u32 (!%p140_p9), %s442_s16, 3  ;;  %s212_s5 = scalar_lea.sflag (!%p140_p9), [#allocation3], %s159_s17 }
  0x10   : > { %s222_s26 = scalar_lea.hbm (!%p140_p9), %s554_s3, %s294_s20 }
  0x11   : > { %s226_s4 = sshll.u32 (!%p140_p9), %s222_s26, 4  ;;  %s227_s4 = int_to_ptr.hbm [resolvable:$true] %s226_s4 }
  0x13   : > { %v180_v0 = vld [vmem:[%s552_s1 + $0x68] sm:$0xff]  ;;  %v179_v1 = vld [vmem:[%s552_s1 + $0x60] sm:$0xff]  ;;  %v178_v2 = vld [vmem:[%s552_s1 + $0x58] sm:$0xff]  ;;  %s163_s24 = scalar_select %p162_p10, %s442_s16, 1  ;;  %vm185_vm0 = vcmask 916480   ;;  %vm209_vm1 = vcmask 523264  }
  0x14   : > { %191 = vmatpush.msra.mxu0 %v180_v0  ;;  %v177_v3 = vld [vmem:[%s552_s1 + $0x50] sm:$0xff]  ;;  %v176_v4 = vld [vmem:[%s552_s1 + $0x48] sm:$0xff]  ;;  %v175_v5 = vld [vmem:[%s552_s1 + $0x40] sm:$0xff]  ;;  %s351_s16 = sshra.s32 %s227_s4, 4  ;;  %s352_s16 = int_to_ptr.hbm [resolvable:$true] %s351_s16 }
  0x15   : > { %v174_v6 = vld [vmem:[%s552_s1 + $0x38] sm:$0xff]  ;;  %v173_v7 = vld [vmem:[%s552_s1 + $0x30] sm:$0xff]  ;;  %v172_v8 = vld [vmem:[%s552_s1 + $0x28] sm:$0xff]  ;;  %s291_s29 = sshll.u32 %s163_s24, 3  ;;  %s353_s6 = scalar_lea.hbm %s352_s16, 8 }
  0x16   : > { %192 = vmatpush.msra.mxu0 %v179_v1  ;;  %v171_v9 = vld [vmem:[%s552_s1 + $0x20] sm:$0xff]  ;;  %v170_v10 = vld [vmem:[%s552_s1 + $0x18] sm:$0xff]  ;;  %v169_v11 = vld [vmem:[%s552_s1 + $0x10] sm:$0xff]  ;;  %s165_s9 = scalar_lea.vmem %s551_s0, %s291_s29  ;;  %s161_s29 = scalar_lea.vmem [#allocation2], %s290_s19 }
  0x17   : > { %v168_v12 = vld [vmem:[%s552_s1 + $0x8] sm:$0xff]  ;;  %v167_v13 = vld [vmem:[%s552_s1] sm:$0xff]  ;;  %s224_s30 = sshll.u32 %s161_s29, 4  ;;  %p354_p11 = scmp.ne.s32.totalorder %s352_s16, %s353_s6  ;;  %s225_s30 = int_to_ptr.vmem [resolvable:$true] %s224_s30 }
  0x18   : > { %193 = vmatpush.msra.mxu0 %v178_v2  ;;  %v166_v14 = vld [vmem:[%s165_s9] sm:$0xff]  ;;  %s357_s9 = scalar_lea.hbm %s554_s3, 16  ;;  %p358_p0 = scmp.lt.s32.totalorder %s352_s16, %s554_s3 }
  0x19   : > { %v336_v15 = vld [vmem:[%s553_s2] ss:$0 sm:$0xff]  ;;  %p355_p12 = pnand %p354_p11, %p459_p5  ;;  %p359_p1 = scmp.lt.s32.totalorder %s357_s9, %s353_s6 }
  0x1a   : > { %194 = vmatpush.msra.mxu0 %v177_v3 }
  0x1b   : > { %p356_p13 = pneg %p355_p12  ;;  %p360_p2 = por %p359_p1, %p358_p0 }
  0x1c   : > { %195 = vmatpush.msra.mxu0 %v176_v4 }
  0x1d   : > { %p361_p3 = pnand %p360_p2, %p356_p13 }
  0x1e   : > { %196 = vmatpush.msra.mxu0 %v175_v5 }
  0x20   : > { %197 = vmatpush.msra.mxu0 %v174_v6 }
  0x22   : > { %198 = vmatpush.msra.mxu0 %v173_v7 }
  0x24   : > { %199 = vmatpush.msra.mxu0 %v172_v8 }
  0x26   : > { %200 = vmatpush.msra.mxu0 %v171_v9 }
  0x28   : > { %201 = vmatpush.msra.mxu0 %v170_v10 }
  0x2a   : > { %202 = vmatpush.msra.mxu0 %v169_v11 }
  0x2c   : > { %203 = vmatpush.msra.mxu0 %v168_v12 }
  0x2e   : > { %204 = vmatpush.msra.mxu0 %v167_v13 }
  0x2f   : > { %292 = vmatmul.msk.f32.vlgmr.msra.gmra.mxu0 %vm185_vm0, %v166_v14 }
  0xac   : > { %v206_v16 = vpop.f32.mrf.mxu0 }
  0xad   : > { %v207_v17 = vadd.f32 %v336_v15, %v206_v16 }
  0xaf   : > { %210 = vst.msk [vmem:[%s161_s29] sm:$0xff] %vm209_vm1, %v207_v17 }
  0xb0   : > { %364 = shalt.err (!%p361_p3)
}
  0xb1   : > { %297 = dma.vmem_to_hbm [thread:$0]  (%p459_p5), %s225_s30, 128, %s227_s4, %s212_s5  }
  0xb2 PF: > { %p303_p4 = scmp.ge.s32.totalorder %s399_s15, 2  ;;  %s238_s17 = sand.u32 1, %s387_s12  }
  0xb3   : > { %s239_s19 = scalar_lea.sflag [#allocation3], %s238_s17 }
  0xb4   : > { %p300_p7 = pnand %p303_p4, %p463_p6 }
  0xb6   : > { %p301_p8 = pneg %p300_p7 }
  0xb8   : > { %382 = dma.done.wait (%p301_p8), %s239_s19, 128  }
  0xb9   : > { %384 = vsyncadd (%p301_p8), %s239_s19, 4294967168  ;;  %p13_p9 = scmp.ge.s32.totalorder %s446_s18, 4   ;;  %s557_s12 = smov %s391_s13 }
  0xba   : > { %s558_s13 = smov %s395_s14  ;;  %s559_s14 = smov %s457_s21 }
  0xbb   : > { %s560_s15 = smov %s446_s18  ;;  %15 = sbr.rel (!%p13_p9) target bundleno = 3 (0x3), region = 67 }
  0xc0   :  { %245 = vsyncpa [#allocation3], 1 }
  0xc1   :  { %247 = vsyncpa [#allocation3 + $0x1], 1 }

// kernel: tpu_custom_call.1
= control target key start
LH: loop header
LB: loop body
LE: loop exit
PB: predicated region body
PF: predicated region fallthrough
CT: control target
= control target key end

     0   :  { %8 = vsyncpa [#allocation3], 0  ;;  %s551_s0 = inlined_call_operand.vmem [shape: f32[16,112], index: 0, kind: input, shape index: {}]   ;;  %s552_s1 = inlined_call_operand.vmem [shape: f32[112,64], index: 1, kind: input, shape index: {}]   ;;  %s553_s2 = inlined_call_operand.vmem [shape: f32[1,64], index: 2, kind: input, shape index: {}]   ;;  %s554_s3 = inlined_call_operand.hbm [shape: f32[16,64], index: 3, kind: output, shape index: {}]  }
   0x1   :  { %10 = vsyncpa [#allocation3 + $0x1], 0  ;;  %s421_s12 = smov 0   ;;  %s423_s13 = smov 0  }
   0x2   :  { %s425_s14 = smov 0   ;;  %s427_s15 = smov 0  }
   0x3 LB: > { %s442_s16 = sadd.s32 4294967295, %s399_s15   ;;  %s286_s17 = sadd.s32 4294967294, %s399_s15   ;;  %s399_s15 = sphi %s427_s15, %s560_s15   ;;  %s395_s14 = sphi %s425_s14, %s559_s14   ;;  %s391_s13 = sphi %s423_s13, %s558_s13   ;;  %s387_s12 = sphi %s421_s12, %s557_s12  }
   0x4   : > { %s446_s18 = sadd.s32 1, %s399_s15   ;;  %s91_s19 = sadd.s32 1, %s395_s14 }
   0x5   : > { %s88_s20 = ssub.s32 %s399_s15, %s446_s18  ;;  %p101_p0 = scmp.ne.s32.totalorder %s395_s14, %s391_s13 }
   0x6   : > { %p89_p1 = scmp.eq.s32.totalorder %s88_s20, 0  ;;  %p102_p2 = scmp.eq.s32.totalorder %s442_s16, 1 }
   0x7   : > { %p107_p3 = scmp.ne.s32.totalorder %s391_s13, %s387_s12  ;;  %p108_p4 = scmp.eq.s32.totalorder %s286_s17, 1 }
   0x8   : > { %s457_s21 = scalar_select %p89_p1, %s395_s14, %s91_s19  }
   0x9   : > { %p459_p5 = por %p102_p2, %p101_p0  ;;  %p463_p6 = por %p108_p4, %p107_p3 }
   0xa   : > { %p289_p7 = scmp.ge.s32.totalorder %s399_s15, 1  ;;  %p139_p8 = scmp.lt.s32.totalorder %s399_s15, 3 }
   0xc   : > { %p140_p9 = pnand %p289_p7, %p139_p8 }
   0xd   : > { %p162_p10 = scmp.lt.s32.totalorder (!%p140_p9), %s442_s16, 1  ;;  %s159_s17 = sand.u32 (!%p140_p9), 1, %s391_s13  }
   0xe   : > { %143 = sbr.rel (%p140_p9) target bundleno = 178 (0xb2), region = 32  ;;  %s290_s19 = sshll.u32 (!%p140_p9), %s159_s17, 3 }
   0xf   : > { %s294_s20 = sshll.u32 (!%p140_p9), %s442_s16, 3  ;;  %s212_s5 = scalar_lea.sflag (!%p140_p9), [#allocation3], %s159_s17 }
  0x10   : > { %s222_s26 = scalar_lea.hbm (!%p140_p9), %s554_s3, %s294_s20 }
  0x11   : > { %s226_s4 = sshll.u32 (!%p140_p9), %s222_s26, 4  ;;  %s227_s4 = int_to_ptr.hbm [resolvable:$true] %s226_s4 }
  0x13   : > { %v180_v0 = vld [vmem:[%s552_s1 + $0x68] sm:$0xff]  ;;  %v179_v1 = vld [vmem:[%s552_s1 + $0x60] sm:$0xff]  ;;  %v178_v2 = vld [vmem:[%s552_s1 + $0x58] sm:$0xff]  ;;  %s163_s24 = scalar_select %p162_p10, %s442_s16, 1  ;;  %vm185_vm0 = vcmask 916480   ;;  %vm209_vm1 = vcmask 523264  }
  0x14   : > { %191 = vmatpush.msra.mxu0 %v180_v0  ;;  %v177_v3 = vld [vmem:[%s552_s1 + $0x50] sm:$0xff]  ;;  %v176_v4 = vld [vmem:[%s552_s1 + $0x48] sm:$0xff]  ;;  %v175_v5 = vld [vmem:[%s552_s1 + $0x40] sm:$0xff]  ;;  %s351_s16 = sshra.s32 %s227_s4, 4  ;;  %s352_s16 = int_to_ptr.hbm [resolvable:$true] %s351_s16 }
  0x15   : > { %v174_v6 = vld [vmem:[%s552_s1 + $0x38] sm:$0xff]  ;;  %v173_v7 = vld [vmem:[%s552_s1 + $0x30] sm:$0xff]  ;;  %v172_v8 = vld [vmem:[%s552_s1 + $0x28] sm:$0xff]  ;;  %s291_s29 = sshll.u32 %s163_s24, 3  ;;  %s353_s6 = scalar_lea.hbm %s352_s16, 8 }
  0x16   : > { %192 = vmatpush.msra.mxu0 %v179_v1  ;;  %v171_v9 = vld [vmem:[%s552_s1 + $0x20] sm:$0xff]  ;;  %v170_v10 = vld [vmem:[%s552_s1 + $0x18] sm:$0xff]  ;;  %v169_v11 = vld [vmem:[%s552_s1 + $0x10] sm:$0xff]  ;;  %s165_s9 = scalar_lea.vmem %s551_s0, %s291_s29  ;;  %s161_s29 = scalar_lea.vmem [#allocation2], %s290_s19 }
  0x17   : > { %v168_v12 = vld [vmem:[%s552_s1 + $0x8] sm:$0xff]  ;;  %v167_v13 = vld [vmem:[%s552_s1] sm:$0xff]  ;;  %s224_s30 = sshll.u32 %s161_s29, 4  ;;  %p354_p11 = scmp.ne.s32.totalorder %s352_s16, %s353_s6  ;;  %s225_s30 = int_to_ptr.vmem [resolvable:$true] %s224_s30 }
  0x18   : > { %193 = vmatpush.msra.mxu0 %v178_v2  ;;  %v166_v14 = vld [vmem:[%s165_s9] sm:$0xff]  ;;  %s357_s9 = scalar_lea.hbm %s554_s3, 16  ;;  %p358_p0 = scmp.lt.s32.totalorder %s352_s16, %s554_s3 }
  0x19   : > { %v336_v15 = vld [vmem:[%s553_s2] ss:$0 sm:$0xff]  ;;  %p355_p12 = pnand %p354_p11, %p459_p5  ;;  %p359_p1 = scmp.lt.s32.totalorder %s357_s9, %s353_s6 }
  0x1a   : > { %194 = vmatpush.msra.mxu0 %v177_v3 }
  0x1b   : > { %p356_p13 = pneg %p355_p12  ;;  %p360_p2 = por %p359_p1, %p358_p0 }
  0x1c   : > { %195 = vmatpush.msra.mxu0 %v176_v4 }
  0x1d   : > { %p361_p3 = pnand %p360_p2, %p356_p13 }
  0x1e   : > { %196 = vmatpush.msra.mxu0 %v175_v5 }
  0x20   : > { %197 = vmatpush.msra.mxu0 %v174_v6 }
  0x22   : > { %198 = vmatpush.msra.mxu0 %v173_v7 }
  0x24   : > { %199 = vmatpush.msra.mxu0 %v172_v8 }
  0x26   : > { %200 = vmatpush.msra.mxu0 %v171_v9 }
  0x28   : > { %201 = vmatpush.msra.mxu0 %v170_v10 }
  0x2a   : > { %202 = vmatpush.msra.mxu0 %v169_v11 }
  0x2c   : > { %203 = vmatpush.msra.mxu0 %v168_v12 }
  0x2e   : > { %204 = vmatpush.msra.mxu0 %v167_v13 }
  0x2f   : > { %292 = vmatmul.msk.f32.vlgmr.msra.gmra.mxu0 %vm185_vm0, %v166_v14 }
  0xac   : > { %v206_v16 = vpop.f32.mrf.mxu0 }
  0xad   : > { %v207_v17 = vadd.f32 %v336_v15, %v206_v16 }
  0xaf   : > { %210 = vst.msk [vmem:[%s161_s29] sm:$0xff] %vm209_vm1, %v207_v17 }
  0xb0   : > { %364 = shalt.err (!%p361_p3)
}
  0xb1   : > { %297 = dma.vmem_to_hbm [thread:$0]  (%p459_p5), %s225_s30, 128, %s227_s4, %s212_s5  }
  0xb2 PF: > { %p303_p4 = scmp.ge.s32.totalorder %s399_s15, 2  ;;  %s238_s17 = sand.u32 1, %s387_s12  }
  0xb3   : > { %s239_s19 = scalar_lea.sflag [#allocation3], %s238_s17 }
  0xb4   : > { %p300_p7 = pnand %p303_p4, %p463_p6 }
  0xb6   : > { %p301_p8 = pneg %p300_p7 }
  0xb8   : > { %382 = dma.done.wait (%p301_p8), %s239_s19, 128  }
  0xb9   : > { %384 = vsyncadd (%p301_p8), %s239_s19, 4294967168  ;;  %p13_p9 = scmp.ge.s32.totalorder %s446_s18, 4   ;;  %s557_s12 = smov %s391_s13 }
  0xba   : > { %s558_s13 = smov %s395_s14  ;;  %s559_s14 = smov %s457_s21 }
  0xbb   : > { %s560_s15 = smov %s446_s18  ;;  %15 = sbr.rel (!%p13_p9) target bundleno = 3 (0x3), region = 67 }
  0xc0   :  { %245 = vsyncpa [#allocation3], 1 }
  0xc1   :  { %247 = vsyncpa [#allocation3 + $0x1], 1 }

</bundles_post_ra>
